<compile_context>
chip_gen: v5e
topology: v5e:2x2
jax: 0.10.0
libtpu: 0.0.40
codegen_flags: <defaults>
</compile_context>

<pallas_src>
import functools

import jax
import jax.numpy as jnp
import numpy as np
from jax import lax
from jax.experimental import pallas as pl
from jax.experimental.pallas import tpu as pltpu

# AVWGCN problem sizes (small, matching the module's forward)
B, N, C_IN, C_OUT, EMB, CHEB_K = 2, 16, 4, 32, 8, 2
P = CHEB_K * C_IN          # graph-support channels fed to node-specific weights
PA = P + 1                 # + constant-1 column carrying the node-specific bias
DROPOUT_RATE = 0.1
KEEP_SCALE = 1.0 / (1.0 - DROPOUT_RATE)
DROP_THRESH_24 = int(round(DROPOUT_RATE * (1 << 24)))   # threshold on 24-bit uniforms

LANES = 128
SAMPLES_PER_STEP = LANES // C_OUT          # 4 MC samples per grid step -> 128-lane stores


def agcrn_mc_dropout_kernel(x_ref, e_ref, erep_ref, tile_ref, pool_ref, bits_ref, o_ref):
    """One AVWGCN forward + SAMPLES_PER_STEP inference-dropout samples.

    x_ref    : [B*N, C_in]        activations, (batch, node)-row layout
    e_ref    : [N, EMB]           node embeddings
    erep_ref : [B*N, EMB*PA]      embeddings repeated to the Khatri-Rao column order
    tile_ref : [PA, EMB*PA]       constant 0/1 selection matrix (xs column tiling)
    pool_ref : [EMB*PA, G*C_out]  flattened weight+bias pool, tiled G times along lanes
    bits_ref : [B*N, G*C_out] i32 uniform 24-bit ints for G dropout masks
    o_ref    : [B*N, G*C_out] f32 G dropout samples of the model output (lane-dense)
    """
    f32 = jnp.float32
    E = e_ref[...]                                                       # [N, EMB]

    # ---- adaptive adjacency: softmax(relu(E @ E^T), axis=1); divide on the EUP ----
    a = lax.dot_general(E, E, (((1,), (1,)), ((), ())), preferred_element_type=f32)
    a = jnp.maximum(a, 0.0)
    a = jnp.exp(a - jnp.max(a, axis=1, keepdims=True))
    adj = a * pl.reciprocal(jnp.sum(a, axis=1, keepdims=True), approx=True)   # [N, N]

    # ---- graph supports: k=0 identity, k=1 adjacency (one small matmul per batch) ----
    x = x_ref[...]                                                       # [B*N, C_in]
    xg = jnp.concatenate(
        [jnp.dot(adj, x[b * N:(b + 1) * N, :], preferred_element_type=f32)
         for b in range(B)], axis=0)                                     # [B*N, C_in]
    ones_col = jnp.ones((B * N, 1), dtype=f32)
    xs_aug = jnp.concatenate([x, xg, ones_col], axis=1)                  # [B*N, PA]

    # ---- node-specific weights: Khatri-Rao expansion + ONE MXU contraction ----
    # xs_tile[r, e*PA+p] = xs_aug[r, p]   (via constant selection matmul, no relayout)
    # y[r, e*PA+p]       = xs_aug[r, p] * E[n(r), e]
    # out_rep[r, j*C+o]  = sum_{e,p} y * pool[e*PA+p, o]   (pool pre-tiled over j)
    xs_tile = jnp.dot(xs_aug, tile_ref[...], preferred_element_type=f32)  # [B*N, EMB*PA]
    y = xs_tile * erep_ref[...]                                           # [B*N, EMB*PA]
    out_rep = jnp.dot(y, pool_ref[...], preferred_element_type=f32)       # [B*N, G*C_out]

    # ---- Monte-Carlo dropout, active at inference (the point of this module) ----
    keep = bits_ref[...] >= DROP_THRESH_24
    o_ref[...] = jnp.where(keep, out_rep * KEEP_SCALE, 0.0).astype(o_ref.dtype)


def _ungroup(grouped, num_samples):
    """[n_groups, B*N, G*C_out] -> [num_samples, B, N, C_out] (pure layout, XLA-side)."""
    n_groups = grouped.shape[0]
    return (grouped.reshape(n_groups, B, N, SAMPLES_PER_STEP, C_OUT)
            .transpose(0, 3, 1, 2, 4)
            .reshape(num_samples, B, N, C_OUT))


def _dropout_bits(key, n_groups):
    """Uniform ints on [0, 2^24) so the in-kernel compare is an unambiguous i32 compare."""
    raw = jax.random.bits(key, (n_groups, B * N, SAMPLES_PER_STEP * C_OUT),
                          dtype=jnp.uint32)
    return (raw >> jnp.uint32(8)).astype(jnp.int32)


@functools.partial(jax.jit, static_argnames=("num_samples",))
def inference_with_dropout(key, x, node_emb, w_pool, b_pool, num_samples=8):
    """x: [B, N, C_in]; w_pool: [EMB, K, C_in, C_out]; b_pool: [EMB, C_out].

    Returns num_samples MC-dropout forward passes, shape [S, B, N, C_out];
    out[s] is one `dropout(model(x))` draw (fresh mask per sample).
    """
    assert num_samples % SAMPLES_PER_STEP == 0
    n_groups = num_samples // SAMPLES_PER_STEP
    f32 = jnp.float32

    # ---- layout plumbing, done by XLA outside the kernel (free) ----
    x_bn = x.reshape(B * N, C_IN).astype(f32)                            # [B*N, C_in]
    emb = node_emb.astype(f32)                                           # [N, EMB]
    e_bn = jnp.tile(emb, (B, 1))                                         # [B*N, EMB]
    e_rep = jnp.repeat(e_bn, PA, axis=1)                                 # [B*N, EMB*PA]
    tile_mat = jnp.tile(jnp.eye(PA, dtype=f32), (1, EMB))                # [PA, EMB*PA]
    pool_w = w_pool.astype(f32).reshape(EMB, P, C_OUT)                   # [EMB, P, C_out]
    pool_aug = jnp.concatenate([pool_w, b_pool.astype(f32)[:, None, :]],
                               axis=1).reshape(EMB * PA, C_OUT)          # [EMB*PA, C_out]
    pool_rep = jnp.tile(pool_aug, (1, SAMPLES_PER_STEP))                 # [EMB*PA, 128]
    bits = _dropout_bits(key, n_groups)                                  # [G, B*N, 128]

    lane_blk = SAMPLES_PER_STEP * C_OUT
    grid_spec = pltpu.PrefetchScalarGridSpec(
        num_scalar_prefetch=0,
        grid=(n_groups,),
        in_specs=[
            pl.BlockSpec((B * N, C_IN), lambda g: (0, 0)),
            pl.BlockSpec((N, EMB), lambda g: (0, 0)),
            pl.BlockSpec((B * N, EMB * PA), lambda g: (0, 0)),
            pl.BlockSpec((PA, EMB * PA), lambda g: (0, 0)),
            pl.BlockSpec((EMB * PA, lane_blk), lambda g: (0, 0)),
            pl.BlockSpec((None, B * N, lane_blk), lambda g: (g, 0, 0)),
        ],
        out_specs=pl.BlockSpec((None, B * N, lane_blk), lambda g: (g, 0, 0)),
    )
    raw = pl.pallas_call(
        agcrn_mc_dropout_kernel,
        out_shape=jax.ShapeDtypeStruct((n_groups, B * N, lane_blk), jnp.float32),
        grid_spec=grid_spec,
        compiler_params=pltpu.CompilerParams(dimension_semantics=("parallel",)),
    )(x_bn, emb, e_rep, tile_mat, pool_rep, bits)

    return _ungroup(raw, num_samples)


def avwgcn_reference(x, E, w_pool, b_pool):
    """Pure-JAX AVWGCN forward (no dropout), for correctness checking."""
    a = jnp.maximum(E @ E.T, 0.0)
    adj = jax.nn.softmax(a, axis=1)
    xg = jnp.einsum("nm,bmi->bni", adj, x)
    xs = jnp.concatenate([x, xg], axis=-1)                               # [B, N, P]
    W = jnp.einsum("ne,ekio->nkio", E, w_pool).reshape(N, P, C_OUT)
    bias = E @ b_pool
    return jnp.einsum("bnp,npo->bno", xs, W) + bias[None]


if __name__ == "__main__":
    key = jax.random.PRNGKey(0)
    k1, k2, k3, k4, k_drop = jax.random.split(key, 5)

    # deterministic synthetic parameters (shapes from AVWGCN.__init__)
    x = jax.random.normal(k1, (B, N, C_IN), dtype=jnp.float32)
    node_emb = jax.random.normal(k2, (N, EMB), dtype=jnp.float32)
    w_pool = jax.random.normal(k3, (EMB, CHEB_K, C_IN, C_OUT), dtype=jnp.float32) * 0.1
    b_pool = jax.random.normal(k4, (EMB, C_OUT), dtype=jnp.float32) * 0.1

    num_samples = 8
    out = inference_with_dropout(k_drop, x, node_emb, w_pool, b_pool,
                                 num_samples=num_samples)
    jax.block_until_ready(out)
    assert out.shape == (num_samples, B, N, C_OUT) and out.dtype == jnp.float32

    # pure-JAX reference with the exact same dropout bits / mask mapping
    model_ref = avwgcn_reference(x, node_emb, w_pool, b_pool)            # [B, N, C_out]
    bits_ref = _dropout_bits(k_drop, num_samples // SAMPLES_PER_STEP)
    keep = _ungroup(bits_ref, num_samples) >= DROP_THRESH_24
    ref = jnp.where(keep, model_ref[None] * KEEP_SCALE, 0.0)
    np.testing.assert_allclose(np.asarray(out), np.asarray(ref), rtol=5e-2, atol=5e-2)

    print("KERNEL_OK")
</pallas_src>

<mosaic_0001>
module attributes {stable_mosaic.version = 11 : i64} {
  func.func @agcrn_mc_dropout_kernel(%arg0: i32, %arg1: memref<32x4xf32, #tpu.memory_space<vmem>>, %arg2: memref<16x8xf32, #tpu.memory_space<vmem>>, %arg3: memref<32x72xf32, #tpu.memory_space<vmem>>, %arg4: memref<9x72xf32, #tpu.memory_space<vmem>>, %arg5: memref<72x128xf32, #tpu.memory_space<vmem>>, %arg6: memref<1x32x128xi32, #tpu.memory_space<vmem>>, %arg7: memref<1x32x128xf32, #tpu.memory_space<vmem>>) attributes {dimension_semantics = [#tpu.dimension_semantics<parallel>], iteration_bounds = array<i64: 2>, scalar_prefetch = 0 : i64, scratch_operands = 0 : i64, tpu.core_type = #tpu.core_type<tc>, window_params = [{pipeline_mode = #tpu.pipeline_mode<synchronous>, transform_indices = @transform_0, window_bounds = array<i64: 32, 4>}, {pipeline_mode = #tpu.pipeline_mode<synchronous>, transform_indices = @transform_1, window_bounds = array<i64: 16, 8>}, {pipeline_mode = #tpu.pipeline_mode<synchronous>, transform_indices = @transform_2, window_bounds = array<i64: 32, 72>}, {pipeline_mode = #tpu.pipeline_mode<synchronous>, transform_indices = @transform_3, window_bounds = array<i64: 9, 72>}, {pipeline_mode = #tpu.pipeline_mode<synchronous>, transform_indices = @transform_4, window_bounds = array<i64: 72, 128>}, {transform_indices = @transform_5, window_bounds = array<i64: 1, 32, 128>}, {transform_indices = @transform_6, window_bounds = array<i64: 1, 32, 128>}]} {
    %c0 = arith.constant 0 : index
    %c0_0 = arith.constant 0 : index
    %0 = vector.load %arg2[%c0, %c0_0] : memref<16x8xf32, #tpu.memory_space<vmem>>, vector<16x8xf32>
    %cst = arith.constant dense<0.000000e+00> : vector<16x16xf32>
    %1 = tpu.matmul %0, %0, %cst {dimension_numbers = #tpu.dot_dimension_numbers<[1], [1], [0], [0], [0, 0, 1, 0], [], []>} : vector<16x8xf32>, vector<16x8xf32>, vector<16x16xf32> -> vector<16x16xf32>
    %cst_1 = arith.constant 0.000000e+00 : f32
    %2 = vector.broadcast %cst_1 : f32 to vector<16x16xf32>
    %3 = arith.maximumf %1, %2 : vector<16x16xf32>
    %cst_2 = arith.constant dense<0xFF800000> : vector<16xf32>
    %4 = vector.multi_reduction <maximumf>, %3, %cst_2 [1] : vector<16x16xf32> to vector<16xf32>
    %5 = vector.shape_cast %4 : vector<16xf32> to vector<16x1xf32>
    %6 = vector.broadcast %5 : vector<16x1xf32> to vector<16x16xf32>
    %7 = arith.subf %3, %6 : vector<16x16xf32>
    %8 = math.exp %7 : vector<16x16xf32>
    %cst_3 = arith.constant dense<0.000000e+00> : vector<16xf32>
    %9 = vector.multi_reduction <add>, %8, %cst_3 [1] : vector<16x16xf32> to vector<16xf32>
    %10 = vector.shape_cast %9 : vector<16xf32> to vector<16x1xf32>
    %11 = tpu.reciprocal %10 {approx = true} : vector<16x1xf32> -> vector<16x1xf32>
    %12 = vector.broadcast %11 : vector<16x1xf32> to vector<16x16xf32>
    %13 = arith.mulf %8, %12 : vector<16x16xf32>
    %c0_4 = arith.constant 0 : index
    %c0_5 = arith.constant 0 : index
    %14 = vector.load %arg1[%c0_4, %c0_5] : memref<32x4xf32, #tpu.memory_space<vmem>>, vector<32x4xf32>
    %15 = vector.extract_strided_slice %14 {offsets = [0, 0], sizes = [16, 4], strides = [1, 1]} : vector<32x4xf32> to vector<16x4xf32>
    %cst_6 = arith.constant dense<0.000000e+00> : vector<16x4xf32>
    %16 = tpu.matmul %13, %15, %cst_6 {dimension_numbers = #tpu.dot_dimension_numbers<[1], [0], [0], [1], [0, 0, 1, 1], [], []>} : vector<16x16xf32>, vector<16x4xf32>, vector<16x4xf32> -> vector<16x4xf32>
    %17 = vector.extract_strided_slice %14 {offsets = [16, 0], sizes = [16, 4], strides = [1, 1]} : vector<32x4xf32> to vector<16x4xf32>
    %cst_7 = arith.constant dense<0.000000e+00> : vector<16x4xf32>
    %18 = tpu.matmul %13, %17, %cst_7 {dimension_numbers = #tpu.dot_dimension_numbers<[1], [0], [0], [1], [0, 0, 1, 1], [], []>} : vector<16x16xf32>, vector<16x4xf32>, vector<16x4xf32> -> vector<16x4xf32>
    %19 = tpu.concatenate %16, %18 in 0 : vector<16x4xf32>, vector<16x4xf32> -> vector<32x4xf32>
    %cst_8 = arith.constant 1.000000e+00 : f32
    %20 = vector.broadcast %cst_8 : f32 to vector<32x1xf32>
    %21 = tpu.concatenate %14, %19, %20 in 1 : vector<32x4xf32>, vector<32x4xf32>, vector<32x1xf32> -> vector<32x9xf32>
    %c0_9 = arith.constant 0 : index
    %c0_10 = arith.constant 0 : index
    %22 = vector.load %arg4[%c0_9, %c0_10] : memref<9x72xf32, #tpu.memory_space<vmem>>, vector<9x72xf32>
    %cst_11 = arith.constant dense<0.000000e+00> : vector<32x72xf32>
    %23 = tpu.matmul %21, %22, %cst_11 {dimension_numbers = #tpu.dot_dimension_numbers<[1], [0], [0], [1], [0, 0, 1, 1], [], []>} : vector<32x9xf32>, vector<9x72xf32>, vector<32x72xf32> -> vector<32x72xf32>
    %c0_12 = arith.constant 0 : index
    %c0_13 = arith.constant 0 : index
    %24 = vector.load %arg3[%c0_12, %c0_13] : memref<32x72xf32, #tpu.memory_space<vmem>>, vector<32x72xf32>
    %25 = arith.mulf %23, %24 : vector<32x72xf32>
    %c0_14 = arith.constant 0 : index
    %c0_15 = arith.constant 0 : index
    %26 = vector.load %arg5[%c0_14, %c0_15] : memref<72x128xf32, #tpu.memory_space<vmem>>, vector<72x128xf32>
    %cst_16 = arith.constant dense<0.000000e+00> : vector<32x128xf32>
    %27 = tpu.matmul %25, %26, %cst_16 {dimension_numbers = #tpu.dot_dimension_numbers<[1], [0], [0], [1], [0, 0, 1, 1], [], []>} : vector<32x72xf32>, vector<72x128xf32>, vector<32x128xf32> -> vector<32x128xf32>
    %c0_17 = arith.constant 0 : index
    %c0_18 = arith.constant 0 : index
    %c0_19 = arith.constant 0 : index
    %28 = vector.load %arg6[%c0_17, %c0_18, %c0_19] : memref<1x32x128xi32, #tpu.memory_space<vmem>>, vector<1x32x128xi32>
    %29 = vector.shape_cast %28 : vector<1x32x128xi32> to vector<32x128xi32>
    %c1677722_i32 = arith.constant 1677722 : i32
    %30 = vector.broadcast %c1677722_i32 : i32 to vector<32x128xi32>
    %31 = arith.cmpi sge, %29, %30 : vector<32x128xi32>
    %cst_20 = arith.constant 1.11111116 : f32
    %32 = vector.broadcast %cst_20 : f32 to vector<32x128xf32>
    %33 = arith.mulf %27, %32 : vector<32x128xf32>
    %cst_21 = arith.constant 0.000000e+00 : f32
    %34 = vector.broadcast %cst_21 : f32 to vector<32x128xf32>
    %35 = arith.select %31, %33, %34 : vector<32x128xi1>, vector<32x128xf32>
    %c0_22 = arith.constant 0 : index
    %c0_23 = arith.constant 0 : index
    %c0_24 = arith.constant 0 : index
    %36 = vector.load %arg7[%c0_22, %c0_23, %c0_24] : memref<1x32x128xf32, #tpu.memory_space<vmem>>, vector<1x32x128xf32>
    %37 = vector.shape_cast %36 : vector<1x32x128xf32> to vector<32x128xf32>
    %38 = vector.shape_cast %35 : vector<32x128xf32> to vector<1x32x128xf32>
    tpu.vector_store %arg7[%c0_22, %c0_23, %c0_24], %38 {strides = array<i32>} : memref<1x32x128xf32, #tpu.memory_space<vmem>>, vector<1x32x128xf32>,
    return
  }
  func.func @transform_0(%arg0: i32) -> (i32, i32) {
    %c0_i32 = arith.constant 0 : i32
    %c0_i32_0 = arith.constant 0 : i32
    %c0_i32_1 = arith.constant 0 : i32
    return %c0_i32, %c0_i32_0 : i32, i32
  }
  func.func @transform_1(%arg0: i32) -> (i32, i32) {
    %c0_i32 = arith.constant 0 : i32
    %c0_i32_0 = arith.constant 0 : i32
    %c0_i32_1 = arith.constant 0 : i32
    return %c0_i32, %c0_i32_0 : i32, i32
  }
  func.func @transform_2(%arg0: i32) -> (i32, i32) {
    %c0_i32 = arith.constant 0 : i32
    %c0_i32_0 = arith.constant 0 : i32
    %c0_i32_1 = arith.constant 0 : i32
    return %c0_i32, %c0_i32_0 : i32, i32
  }
  func.func @transform_3(%arg0: i32) -> (i32, i32) {
    %c0_i32 = arith.constant 0 : i32
    %c0_i32_0 = arith.constant 0 : i32
    %c0_i32_1 = arith.constant 0 : i32
    return %c0_i32, %c0_i32_0 : i32, i32
  }
  func.func @transform_4(%arg0: i32) -> (i32, i32) {
    %c0_i32 = arith.constant 0 : i32
    %c0_i32_0 = arith.constant 0 : i32
    %c0_i32_1 = arith.constant 0 : i32
    return %c0_i32, %c0_i32_0 : i32, i32
  }
  func.func @transform_5(%arg0: i32) -> (i32, i32, i32) {
    %c0_i32 = arith.constant 0 : i32
    %c0_i32_0 = arith.constant 0 : i32
    %c0_i32_1 = arith.constant 0 : i32
    return %arg0, %c0_i32, %c0_i32_0 : i32, i32, i32
  }
  func.func @transform_6(%arg0: i32) -> (i32, i32, i32) {
    %c0_i32 = arith.constant 0 : i32
    %c0_i32_0 = arith.constant 0 : i32
    %c0_i32_1 = arith.constant 0 : i32
    return %arg0, %c0_i32, %c0_i32_0 : i32, i32, i32
  }
}

</mosaic_0001>

<bundles_post_ra>
// kernel: tile.18
= control target key start
LH: loop header
LB: loop body
LE: loop exit
PB: predicated region body
PF: predicated region fallthrough
CT: control target
= control target key end

     0   :  { %vm36_vm0 = vcmask 1047556   ;;  %vm38_vm1 = vcmask 130048   ;;  %vm48_vm2 = vcmask 261248   ;;  %s99_s0 = inlined_call_operand.vmem [shape: f32[2,16,8], index: 0, kind: input, shape index: {}]   ;;  %s100_s1 = inlined_call_operand.vmem [shape: f32[32,8], index: 1, kind: output, shape index: {}]  }
   0x1   :  { %v50_v0 = vld [vmem:[%s99_s0 + $0xe] sm:$0x3]  ;;  %v51_v1 = vld [vmem:[%s99_s0 + $0xc] sm:$0x3]  ;;  %v52_v2 = vld [vmem:[%s99_s0 + $0xa] sm:$0x3] }
   0x2   :  { %7 = vst [vmem:[#allocation0 + $0x38] sm:$0x3] %v50_v0  ;;  %v53_v3 = vld [vmem:[%s99_s0 + $0x8] sm:$0x3]  ;;  %v54_v4 = vld [vmem:[%s99_s0 + $0x6] sm:$0x3] }
   0x3   :  { %11 = vst [vmem:[#allocation0 + $0x30] sm:$0x3] %v51_v1  ;;  %v55_v5 = vld [vmem:[%s99_s0 + $0x4] sm:$0x3]  ;;  %v56_v6 = vld [vmem:[%s99_s0 + $0x2] sm:$0x3] }
   0x4   :  { %15 = vst [vmem:[#allocation0 + $0x28] sm:$0x3] %v52_v2  ;;  %v32_v7 = vld [vmem:[%s99_s0] sm:$0x3]  ;;  %s58_s0 = smov 16  }
   0x5   :  { %19 = vst [vmem:[#allocation0 + $0x20] sm:$0x3] %v53_v3 }
   0x6   :  { %23 = vst [vmem:[#allocation0 + $0x18] sm:$0x3] %v54_v4 }
   0x7   :  { %27 = vst [vmem:[#allocation0 + $0x10] sm:$0x3] %v55_v5 }
   0x8   :  { %31 = vst [vmem:[#allocation0 + $0x8] sm:$0x3] %v56_v6 }
   0x9   :  { %33 = vst [vmem:[#allocation0] sm:$0x3] %v32_v7 }
   0xc   :  { %v35_v8 = vld [vmem:[#allocation0] ss:$8 sm:$0xf0]   ;;  %v43_v9 = vld [vmem:[#allocation0 + $0x1] ss:$8 sm:$0xf0]  }
  0x10   :  { %v34_v10 = vld [vmem:[#allocation0] ss:$8 sm:$0xf]   ;;  %v41_v11 = vld [vmem:[#allocation0 + $0x1] ss:$8 sm:$0xf]  }
  0x11   :  { %v37_v12 = vsel %vm36_vm0, %v35_v8, %v34_v10  ;;  %v45_v13 = vsel %vm36_vm0, %v43_v9, %v41_v11 }
  0x12   :  { %46 = vrot.lane.b32.xlu0 %v45_v13, %s58_s0  ;;  %39 = vst.msk [vmem:[%s100_s1] sm:$0xff] %vm38_vm1, %v37_v12  }
  0x84   :  { %v47_v14 = vpop.permute.xlu0 %46  }
  0x85   :  { %49 = vst.msk [vmem:[%s100_s1] sm:$0xff] %vm48_vm2, %v47_v14  }

// kernel: tile.23
= control target key start
LH: loop header
LB: loop body
LE: loop exit
PB: predicated region body
PF: predicated region fallthrough
CT: control target
= control target key end

     0   :  { %vm4_vm0 = vcmask 1047556   ;;  %s169_s14 = smov 54   ;;  %s170_s15 = smov 63   ;;  %vm6_vm1 = vcmask 72704   ;;  %vm21_vm2 = vcmask 589304   ;;  %vm38_vm3 = vcmask 515504   ;;  %s314_s0 = inlined_call_operand.vmem [shape: f32[9,8,9], index: 0, kind: input, shape index: {}]   ;;  %s315_s1 = inlined_call_operand.vmem [shape: f32[9,72], index: 1, kind: output, shape index: {}]  }
   0x1   :  { %v138_v0 = vld [vmem:[%s314_s0 + $0x6] ss:$8 sm:$0xf]   ;;  %v134_v3 = vld [vmem:[%s314_s0 + $0x7] ss:$8 sm:$0xf]  }
   0x2   :  { %v139_v1 = vld [vmem:[%s314_s0 + $0x6] ss:$8 sm:$0xf0]   ;;  %v135_v4 = vld [vmem:[%s314_s0 + $0x7] ss:$8 sm:$0xf0]  }
   0x3   :  { %v35_v2 = vsel %vm4_vm0, %v139_v1, %v138_v0  ;;  %v18_v5 = vsel %vm4_vm0, %v135_v4, %v134_v3  ;;  %v142_v6 = vld [vmem:[%s314_s0 + $0x5] ss:$8 sm:$0xf]   ;;  %v140_v8 = vld [vmem:[%s314_s0 + $0x46] sm:$0x1]   ;;  %s171_s24 = smov 45  }
   0x4   :  { %36 = vrot.lane.b32.xlu1 %v35_v2, %s169_s14  ;;  %19 = vrot.lane.b32.xlu0 %v18_v5, %s170_s15  ;;  %v143_v7 = vld [vmem:[%s314_s0 + $0x5] ss:$8 sm:$0xf0]   ;;  %v136_v10 = vld [vmem:[%s314_s0 + $0x47] sm:$0x1]   ;;  %s172_s4 = smov 36  }
   0x5   :  { %v52_v9 = vsel %vm4_vm0, %v143_v7, %v142_v6  ;;  %v146_v11 = vld [vmem:[%s314_s0 + $0x4] ss:$8 sm:$0xf]   ;;  %v144_v13 = vld [vmem:[%s314_s0 + $0x45] sm:$0x1]   ;;  %s174_s16 = smov 18  }
   0x6   :  { %53 = vrot.lane.b32.xlu2 %v52_v9, %s171_s24  ;;  %v147_v12 = vld [vmem:[%s314_s0 + $0x4] ss:$8 sm:$0xf0]   ;;  %v150_v16 = vld [vmem:[%s314_s0 + $0x3] ss:$8 sm:$0xf]  }
   0x7   :  { %v148_v14 = vld [vmem:[%s314_s0 + $0x44] sm:$0x1]   ;;  %v69_v15 = vsel %vm4_vm0, %v147_v12, %v146_v11  ;;  %v151_v17 = vld [vmem:[%s314_s0 + $0x3] ss:$8 sm:$0xf0]   ;;  %s175_s25 = smov 9  }
   0x8   :  { %v154_v18 = vld [vmem:[%s314_s0 + $0x2] ss:$8 sm:$0xf]   ;;  %v86_v20 = vsel %vm4_vm0, %v151_v17, %v150_v16  ;;  %v152_v22 = vld [vmem:[%s314_s0 + $0x43] sm:$0x1]   ;;  %vm55_vm4 = vcmask 441704  }
   0x9   :  { %v155_v19 = vld [vmem:[%s314_s0 + $0x2] ss:$8 sm:$0xf0]   ;;  %v158_v23 = vld [vmem:[%s314_s0 + $0x1] ss:$8 sm:$0xf]  }
   0xa   :  { %v103_v21 = vsel %vm4_vm0, %v155_v19, %v154_v18  ;;  %v159_v24 = vld [vmem:[%s314_s0 + $0x1] ss:$8 sm:$0xf0]   ;;  %v156_v25 = vld [vmem:[%s314_s0 + $0x42] sm:$0x1]   ;;  %vm72_vm5 = vcmask 367904  }
   0xb   :  { %v160_v26 = vld [vmem:[%s314_s0 + $0x41] sm:$0x1]   ;;  %v120_v27 = vsel %vm4_vm0, %v159_v24, %v158_v23  ;;  %v2_v28 = vld [vmem:[%s314_s0] ss:$8 sm:$0xf]   ;;  %vm89_vm6 = vcmask 294104  }
   0xc   :  { %42 = vrot.lane.b32.xlu1 %v140_v8, %s169_s14  ;;  %25 = vrot.lane.b32.xlu0 %v136_v10, %s170_s15  ;;  %s173_s15 = smov 27   ;;  %v3_v29 = vld [vmem:[%s314_s0] ss:$8 sm:$0xf0]   ;;  %vm106_vm7 = vcmask 220304   ;;  %vm123_vm8 = vcmask 146504  }
   0xd   :  { %v5_v30 = vsel %vm4_vm0, %v3_v29, %v2_v28  ;;  %v132_v31 = vld [vmem:[%s314_s0 + $0x40] sm:$0x1]  }
   0xe   :  { %59 = vrot.lane.b32.xlu2 %v144_v13, %s171_s24  ;;  %7 = vst.msk [vmem:[%s315_s1] sm:$0xff] %vm6_vm1, %v5_v30  }
   0xf   :  { %133 = vst.msk [vmem:[%s315_s1 + $0x8] sm:$0x1] %vm6_vm1, %v132_v31  }
  0x14   :  { %76 = vrot.lane.b32.xlu1 %v148_v14, %s172_s4  ;;  %70 = vrot.lane.b32.xlu0 %v69_v15, %s172_s4 }
  0x16   :  { %87 = vrot.lane.b32.xlu2 %v86_v20, %s173_s15 }
  0x1c   :  { %104 = vrot.lane.b32.xlu1 %v103_v21, %s174_s16  ;;  %93 = vrot.lane.b32.xlu0 %v152_v22, %s173_s15 }
  0x1e   :  { %110 = vrot.lane.b32.xlu2 %v156_v25, %s174_s16 }
  0x24   :  { %127 = vrot.lane.b32.xlu1 %v160_v26, %s175_s25  ;;  %121 = vrot.lane.b32.xlu0 %v120_v27, %s175_s25 }
  0x60   :  { %v54_v32 = vpop.permute.xlu2 %53  }
  0x68   :  { %v60_v33 = vpop.permute.xlu2 %59  }
  0x70   :  { %v88_v34 = vpop.permute.xlu2 %87  }
  0x76   :  { %v37_v35 = vpop.permute.xlu1 %36   ;;  %v20_v36 = vpop.permute.xlu0 %19  }
  0x77   :  { %22 = vst.msk [vmem:[%s315_s1] sm:$0xff] %vm21_vm2, %v20_v36  }
  0x78   :  { %39 = vst.msk [vmem:[%s315_s1] sm:$0xff] %vm38_vm3, %v37_v35   ;;  %v111_v37 = vpop.permute.xlu2 %110  }
  0x79   :  { %56 = vst.msk [vmem:[%s315_s1] sm:$0xff] %vm55_vm4, %v54_v32  }
  0x7e   :  { %v43_v38 = vpop.permute.xlu1 %42   ;;  %v26_v39 = vpop.permute.xlu0 %25  }
  0x7f   :  { %137 = vst.msk [vmem:[%s315_s1 + $0x8] sm:$0x1] %vm21_vm2, %v26_v39  }
  0x80   :  { %141 = vst.msk [vmem:[%s315_s1 + $0x8] sm:$0x1] %vm38_vm3, %v43_v38  }
  0x81   :  { %145 = vst.msk [vmem:[%s315_s1 + $0x8] sm:$0x1] %vm55_vm4, %v60_v33  }
  0x86   :  { %v77_v40 = vpop.permute.xlu1 %76   ;;  %v71_v41 = vpop.permute.xlu0 %70  }
  0x87   :  { %149 = vst.msk [vmem:[%s315_s1 + $0x8] sm:$0x1] %vm72_vm5, %v77_v40  }
  0x88   :  { %73 = vst.msk [vmem:[%s315_s1] sm:$0xff] %vm72_vm5, %v71_v41  }
  0x89   :  { %90 = vst.msk [vmem:[%s315_s1] sm:$0xff] %vm89_vm6, %v88_v34  }
  0x8e   :  { %v105_v42 = vpop.permute.xlu1 %104   ;;  %v94_v43 = vpop.permute.xlu0 %93  }
  0x8f   :  { %107 = vst.msk [vmem:[%s315_s1] sm:$0xff] %vm106_vm7, %v105_v42  }
  0x90   :  { %153 = vst.msk [vmem:[%s315_s1 + $0x8] sm:$0x1] %vm89_vm6, %v94_v43  }
  0x91   :  { %157 = vst.msk [vmem:[%s315_s1 + $0x8] sm:$0x1] %vm106_vm7, %v111_v37  }
  0x96   :  { %v128_v44 = vpop.permute.xlu1 %127   ;;  %v122_v45 = vpop.permute.xlu0 %121  }
  0x97   :  { %161 = vst.msk [vmem:[%s315_s1 + $0x8] sm:$0x1] %vm123_vm8, %v128_v44  }
  0x98   :  { %124 = vst.msk [vmem:[%s315_s1] sm:$0xff] %vm123_vm8, %v122_v45  }

// kernel: inference_with_dropout.1
= control target key start
LH: loop header
LB: loop body
LE: loop exit
PB: predicated region body
PF: predicated region fallthrough
CT: control target
= control target key end

     0   :  { %s681_s21 = smov 0   ;;  %s797_s0 = inlined_call_operand.vmem [shape: f32[32,4], index: 0, kind: input, shape index: {}]   ;;  %s798_s1 = inlined_call_operand.vmem [shape: f32[16,8], index: 1, kind: input, shape index: {}]   ;;  %s799_s2 = inlined_call_operand.vmem [shape: f32[32,72], index: 2, kind: input, shape index: {}]   ;;  %s800_s3 = inlined_call_operand.vmem [shape: f32[9,72], index: 3, kind: input, shape index: {}]   ;;  %s801_s4 = inlined_call_operand.vmem [shape: f32[72,128], index: 4, kind: input, shape index: {}]   ;;  %s802_s5 = inlined_call_operand.vmem [shape: s32[2,32,128], index: 5, kind: input, shape index: {}]   ;;  %s803_s6 = inlined_call_operand.vmem [shape: f32[2,32,128], index: 6, kind: output, shape index: {}]  }
   0x1 LB: > { %s572_s22 = sadd.s32 4294967295, %s643_s21   ;;  %p576_p0 = scmp.ge.s32.totalorder %s643_s21, 1  ;;  %s643_s21 = sphi %s681_s21, %s16_s21  }
   0x2   : > { %p212_p1 = scmp.lt.s32.totalorder %s643_s21, 3 }
   0x4   : > { %p213_p2 = pnand %p576_p0, %p212_p1 }
   0x5   : > { %s645_s13 = smov (!%p213_p2), 4   ;;  %p242_p3 = scmp.lt.s32.totalorder (!%p213_p2), %s572_s22, 1 }
   0x6   : > { %216 = sbr.rel (%p213_p2) target bundleno = 928 (0x3a0), region = 44 }
   0xb   : > { %v253_v0 = vld [vmem:[%s798_s1 + $0x8] sm:$0xff]  ;;  %vm254_vm0 = vcmask 64512   ;;  %v252_v1 = vld [vmem:[%s798_s1] sm:$0xff]  ;;  %vm286_vm1 = vcmask 130048   ;;  %v709_v19 = vld [vmem:[%s797_s0 + $0x18] sm:$0xff]  ;;  %vm405_vm2 = vcmask 1040384  }
   0xc   : > { %581 = vmatpush.xpose.msk.msra.mxu0 %vm254_vm0, %v253_v0  ;;  %v310_v18 = vld [vmem:[%s797_s0 + $0x8] sm:$0xff]  ;;  %356 = vmatpush.msra.mxu2 %v709_v19  ;;  %v309_v20 = vld [vmem:[%s797_s0] sm:$0xff]  ;;  %v718_v21 = vld [vmem:[%s797_s0 + $0x10] sm:$0xff]  ;;  %vm381_vm3 = vcmask 31744   ;;  %vm392_vm4 = vcmask 72704   ;;  %vm455_vm5 = vcmask 588800  }
   0xd   : > { %333 = vmatpush.msra.mxu1 %v310_v18  ;;  %v391_v28 = vld [vmem:[%s800_s3 + $0x8] sm:$0x1]  ;;  %v390_v33 = vld [vmem:[%s800_s3] sm:$0xff]  ;;  %v453_v40 = vld [vmem:[%s801_s4 + $0x38] sm:$0xff]  ;;  %s805_s22 = smov (!%p242_p3, %s572_s22), 1 }
   0xe   : > { %357 = vmatpush.msra.mxu2 %v718_v21  ;;  %589 = vmatpush.msk.msra.mxu3 %vm405_vm2, %v391_v28  ;;  %v454_v39 = vld [vmem:[%s801_s4 + $0x40] sm:$0xff]  ;;  %v452_v42 = vld [vmem:[%s801_s4 + $0x30] sm:$0xff]  ;;  %v451_v43 = vld [vmem:[%s801_s4 + $0x28] sm:$0xff]  ;;  %s600_s20 = sshll.u32 %s805_s22, 5 }
   0xf   : > { %334 = vmatpush.msra.mxu1 %v309_v20  ;;  %v450_v44 = vld [vmem:[%s801_s4 + $0x20] sm:$0xff]  ;;  %v449_v45 = vld [vmem:[%s801_s4 + $0x18] sm:$0xff]  ;;  %v448_v46 = vld [vmem:[%s801_s4 + $0x10] sm:$0xff]  ;;  %s246_s25 = scalar_lea.vmem %s802_s5, %s600_s20  ;;  %s251_s28 = scalar_lea.vmem %s803_s6, %s600_s20 }
  0x10   : > { %582 = vmatpush.xpose.msk.msra.mxu0 %vm254_vm0, %v252_v1  ;;  %424 = vmatpush.msra.mxu3 %v390_v33  ;;  %v447_v53 = vld [vmem:[%s801_s4 + $0x8] sm:$0xff]  ;;  %v446_v54 = vld [vmem:[%s801_s4] sm:$0xff]  ;;  %v440_v61 = vld [vmem:[%s799_s2 + $0x10] sm:$0xff] }
  0x11   : > { %602 = vmatpush.msrb.mxu1 %v454_v39  ;;  %603 = vmatpush.msrb.mxu2 %v454_v39  ;;  %v438_v55 = vld [vmem:[%s799_s2] sm:$0xff]  ;;  %v439_v58 = vld [vmem:[%s799_s2 + $0x8] sm:$0xff] }
  0x13   : > { %583 = vmatmul.msk.f32.vlgmr.msra.gmra.mxu0 %vm254_vm0, %v252_v1  ;;  %604 = vmatpush.msrb.mxu1 %v453_v40 }
  0x14   : > { %475 = vmatpush.msrb.mxu0 %v454_v39  ;;  %605 = vmatpush.msrb.mxu2 %v453_v40 }
  0x15   : > { %606 = vmatpush.msrb.mxu1 %v452_v42 }
  0x16   : > { %476 = vmatpush.msrb.mxu0 %v453_v40  ;;  %607 = vmatpush.msrb.mxu2 %v452_v42 }
  0x17   : > { %608 = vmatpush.msrb.mxu1 %v451_v43 }
  0x18   : > { %477 = vmatpush.msrb.mxu0 %v452_v42  ;;  %609 = vmatpush.msrb.mxu2 %v451_v43 }
  0x19   : > { %610 = vmatpush.msrb.mxu1 %v450_v44 }
  0x1a   : > { %478 = vmatpush.msrb.mxu0 %v451_v43  ;;  %611 = vmatpush.msrb.mxu2 %v450_v44 }
  0x1b   : > { %584 = vmatmul.msk.f32.gmra.mxu0 %vm254_vm0, %v253_v0  ;;  %612 = vmatpush.msrb.mxu1 %v449_v45  ;;  %v441_v0 = vld [vmem:[%s799_s2 + $0x18] sm:$0xff] }
  0x1c   : > { %479 = vmatpush.msrb.mxu0 %v450_v44  ;;  %613 = vmatpush.msrb.mxu2 %v449_v45 }
  0x1d   : > { %614 = vmatpush.msrb.mxu1 %v448_v46 }
  0x1e   : > { %480 = vmatpush.msrb.mxu0 %v449_v45  ;;  %615 = vmatpush.msrb.mxu2 %v448_v46 }
  0x1f   : > { %616 = vmatpush.msrb.mxu1 %v447_v53 }
  0x20   : > { %481 = vmatpush.msrb.mxu0 %v448_v46  ;;  %617 = vmatpush.msrb.mxu2 %v447_v53 }
  0x21   : > { %618 = vmatpush.msrb.mxu1 %v446_v54 }
  0x22   : > { %482 = vmatpush.msrb.mxu0 %v447_v53  ;;  %619 = vmatpush.msrb.mxu2 %v446_v54 }
  0x24   : > { %483 = vmatpush.msrb.mxu0 %v446_v54 }
  0x90   : > { %v278_v2 = vpop.f32.mrf.mxu0 }
  0x91   : > { %v284_v3 = vmax.f32 %v278_v2, 0.0 }
  0x93   : > { %v287_v4 = vsel %vm286_vm1, %v284_v3, -inf }
  0x94   : > { %288 = vmax.xlane.f32.xlu0 %v287_v4 }
  0x98   : > { %v281_v5 = vpop.f32.mrf.mxu0 }
  0x99   : > { %v285_v6 = vmax.f32 %v281_v5, 0.0 }
  0x9b   : > { %v290_v7 = vsel %vm286_vm1, %v285_v6, -inf }
  0x9c   : > { %291 = vmax.xlane.f32.xlu0 %v290_v7  ;;  %v498_v7 = vld [vmem:[%s246_s25 + $0x8] sm:$0xff] }
  0x9d   : > { %vm502_vm7 = vcmp.ge.s32.totalorder %v498_v7, 1677722 }
 0x107   : > { %v289_v8 = vpop.xlane.xlu0 %288 }
 0x108   : > { %v293_v9 = vsub.f32 %v284_v3, %v289_v8  ;;  %v497_v3 = vld [vmem:[%s246_s25] sm:$0xff] }
 0x109   : > { %vm501_vm6 = vcmp.ge.s32.totalorder %v497_v3, 1677722 }
 0x10a   : > { %v295_v10 = vmul.f32 1.442695, %v293_v9 }
 0x10c   : > { %629 = vpow2.f32 %v295_v10 }
 0x10f   : > { %v292_v11 = vpop.xlane.xlu0 %291 }
 0x110   : > { %v294_v12 = vsub.f32 %v285_v6, %v292_v11  ;;  %v499_v11 = vld [vmem:[%s246_s25 + $0x10] sm:$0xff] }
 0x111   : > { %vm503_vm8 = vcmp.ge.s32.totalorder %v499_v11, 1677722 }
 0x112   : > { %v630_v13 = vpop.eup %629  ;;  %v297_v14 = vmul.f32 1.442695, %v294_v12 }
 0x113   : > { %v299_v15 = vsel %vm286_vm1, %v630_v13, 0.0 }
 0x114   : > { %631 = vpow2.f32 %v297_v14  ;;  %300 = vadd.xlane.f32.xlu1 %v299_v15  ;;  %v500_v15 = vld [vmem:[%s246_s25 + $0x18] sm:$0xff] }
 0x115   : > { %vm504_vm9 = vcmp.ge.s32.totalorder %v500_v15, 1677722 }
 0x11a   : > { %v632_v16 = vpop.eup %631 }
 0x11b   : > { %v302_v17 = vsel %vm286_vm1, %v632_v16, 0.0 }
 0x11c   : > { %303 = vadd.xlane.f32.xlu1 %v302_v17 }
 0x187   : > { %v301_v22 = vpop.xlane.xlu1 %300 }
 0x188   : > { %633 = vrcp.f32 %v301_v22 }
 0x18e   : > { %v634_v23 = vpop.eup %633 }
 0x18f   : > { %v304_v24 = vpop.xlane.xlu1 %303  ;;  %v307_v25 = vmul.f32 %v634_v23, %v630_v13 }
 0x190   : > { %635 = vrcp.f32 %v304_v24 }
 0x191   : > { %585 = vmatmul.msk.f32.vlgmr.msra.gmra.mxu1 %vm286_vm1, %v307_v25  ;;  %587 = vmatmul.msk.f32.vlgmr.msra.gmra.mxu2 %vm286_vm1, %v307_v25 }
 0x196   : > { %v636_v26 = vpop.eup %635 }
 0x197   : > { %v308_v27 = vmul.f32 %v636_v26, %v632_v16 }
 0x199   : > { %586 = vmatmul.msk.f32.gmra.mxu1 %vm286_vm1, %v308_v27  ;;  %588 = vmatmul.msk.f32.gmra.mxu2 %vm286_vm1, %v308_v27 }
 0x20e   : > { %v336_v29 = vpop.f32.mrf.mxu1 }
 0x20f   : > { %369 = vrot.lane.b32.xlu2 %v336_v29, %s645_s13 }
 0x214   : > { %v359_v30 = vpop.f32.mrf.mxu2 }
 0x215   : > { %373 = vrot.lane.b32.xlu0 %v359_v30, %s645_s13 }
 0x216   : > { %v339_v31 = vpop.f32.mrf.mxu1 }
 0x217   : > { %371 = vrot.lane.b32.xlu2 %v339_v31, %s645_s13 }
 0x21c   : > { %v362_v32 = vpop.f32.mrf.mxu2 }
 0x21d   : > { %375 = vrot.lane.b32.xlu1 %v362_v32, %s645_s13 }
 0x269   : > { %v370_v34 = vpop.permute.xlu2 %369 }
 0x26a   : > { %v382_v35 = vsel %vm381_vm3, %v309_v20, %v370_v34 }
 0x26b   : > { %v386_v36 = vsel %vm254_vm0, %v382_v35, 1.0 }
 0x26c   : > { %590 = vmatmul.msk.f32.vlgmr.msra.gmra.mxu3 %vm392_vm4, %v386_v36 }
 0x271   : > { %v372_v37 = vpop.permute.xlu2 %371 }
 0x272   : > { %v383_v38 = vsel %vm381_vm3, %v310_v18, %v372_v37 }
 0x273   : > { %v387_v41 = vsel %vm254_vm0, %v383_v38, 1.0 }
 0x274   : > { %591 = vmatmul.msk.f32.gmra.mxu3 %vm392_vm4, %v387_v41 }
 0x287   : > { %v374_v47 = vpop.permute.xlu0 %373 }
 0x288   : > { %v384_v48 = vsel %vm381_vm3, %v718_v21, %v374_v47 }
 0x289   : > { %v388_v49 = vsel %vm254_vm0, %v384_v48, 1.0 }
 0x28a   : > { %592 = vmatmul.msk.f32.gmra.mxu3 %vm392_vm4, %v388_v49 }
 0x28f   : > { %v376_v50 = vpop.permute.xlu1 %375 }
 0x290   : > { %v385_v51 = vsel %vm381_vm3, %v709_v19, %v376_v50 }
 0x291   : > { %v389_v52 = vsel %vm254_vm0, %v385_v51, 1.0 }
 0x292   : > { %593 = vmatmul.msk.f32.gmra.mxu3 %vm392_vm4, %v389_v52 }
 0x2ef   : > { %v426_v56 = vpop.f32.mrf.mxu3 }
 0x2f0   : > { %v442_v57 = vmul.f32 %v438_v55, %v426_v56 }
 0x2f2   : > { %594 = vmatmul.msk.f32.vlgmr.msrb.gmra.mxu0 %vm455_vm5, %v442_v57 }
 0x2f7   : > { %v429_v59 = vpop.f32.mrf.mxu3 }
 0x2f8   : > { %v443_v60 = vmul.f32 %v439_v58, %v429_v59 }
 0x2fa   : > { %595 = vmatmul.msk.f32.vlgmr.msrb.gmra.mxu1 %vm455_vm5, %v443_v60 }
 0x30d   : > { %v432_v62 = vpop.f32.mrf.mxu3 }
 0x30e   : > { %v444_v63 = vmul.f32 %v440_v61, %v432_v62 }
 0x310   : > { %596 = vmatmul.msk.f32.vlgmr.msrb.gmra.mxu2 %vm455_vm5, %v444_v63 }
 0x315   : > { %v435_v1 = vpop.f32.mrf.mxu3 }
 0x316   : > { %v445_v2 = vmul.f32 %v441_v0, %v435_v1 }
 0x318   : > { %597 = vmatmul.msk.f32.gmra.mxu2 %vm455_vm5, %v445_v2 }
 0x36f   : > { %v485_v4 = vpop.f32.mrf.mxu0 }
 0x370   : > { %v505_v5 = vmul.f32 1.1111112, %v485_v4 }
 0x372   : > { %v509_v6 = vsel %vm501_vm6, %v505_v5, 0.0 }
 0x373   : > { %513 = vst [vmem:[%s251_s28] sm:$0xff] %v509_v6 }
 0x377   : > { %v488_v8 = vpop.f32.mrf.mxu1 }
 0x378   : > { %v506_v9 = vmul.f32 1.1111112, %v488_v8 }
 0x37a   : > { %v510_v10 = vsel %vm502_vm7, %v506_v9, 0.0 }
 0x37b   : > { %514 = vst [vmem:[%s251_s28 + $0x8] sm:$0xff] %v510_v10 }
 0x393   : > { %v491_v12 = vpop.f32.mrf.mxu2 }
 0x394   : > { %v507_v13 = vmul.f32 1.1111112, %v491_v12 }
 0x396   : > { %v511_v14 = vsel %vm503_vm8, %v507_v13, 0.0 }
 0x397   : > { %515 = vst [vmem:[%s251_s28 + $0x10] sm:$0xff] %v511_v14 }
 0x39b   : > { %v494_v16 = vpop.f32.mrf.mxu2 }
 0x39c   : > { %v508_v17 = vmul.f32 1.1111112, %v494_v16 }
 0x39e   : > { %v512_v18 = vsel %vm504_vm9, %v508_v17, 0.0 }
 0x39f   : > { %516 = vst [vmem:[%s251_s28 + $0x18] sm:$0xff] %v512_v18 }
 0x3a0 PF: > { %s16_s21 = sadd.s32 1, %s643_s21  }
 0x3a1   : > { %p13_p4 = scmp.ge.s32.totalorder %s16_s21, 4  }
 0x3a3   :  { %15 = sbr.rel (!%p13_p4) target bundleno = 1 (0x1), region = 74 }

</bundles_post_ra>
